<compile_context>
chip_gen: v6e
topology: v6e:2x2x1
jax: 0.10.0
libtpu: 0.0.40
codegen_flags: <defaults>
</compile_context>

<pallas_src>
import math
import functools

import jax
import jax.numpy as jnp
from jax.experimental import pallas as pl
from jax.experimental.pallas import tpu as pltpu

# Flip to jnp.bfloat16 for higher MXU throughput at GPT scale (keep f32
# accumulation via preferred_element_type); loosen the parity tolerance then.
MATMUL_DTYPE = jnp.float32
_EPS = 1e-5
_NEG_BIG = -1e30   # finite "-inf" so fully-masked / padded rows can never NaN


# ----------------------------- attention kernel ------------------------------

def _attn_kernel(seq, d_head,
                 x_ref, ln1_w_ref, ln1_b_ref,
                 wqkv_ref, bqkv_ref, wattn_ref, battn_ref,
                 o_ref, h1_ref):
    """One (batch, head) grid step of  x1 = x + battn + sum_h proj_h(SDPA_h(ln1(x)))."""
    h = pl.program_id(1)

    # Per-batch work done once, on the first head: LayerNorm1 into VMEM scratch
    # and init of the residual accumulator held in the output block (same block
    # index for every h -> resident across the 'arbitrary' head axis).
    @pl.when(h == 0)
    def _init():
        xb = x_ref[0]                                        # (T, C)
        mu = jnp.mean(xb, axis=-1, keepdims=True)
        var = jnp.mean((xb - mu) ** 2, axis=-1, keepdims=True)
        h1_ref[...] = ((xb - mu) * jax.lax.rsqrt(var + _EPS)
                       * ln1_w_ref[...] + ln1_b_ref[...])
        o_ref[0] = xb + battn_ref[...]        # residual + proj bias (added once)

    h1 = h1_ref[...]

    # Fused per-head QKV projection: one MXU dot with N = 3*Dh; per-head weight
    # selected by the BlockSpec index_map; 1/sqrt(Dh) folded into the Q columns.
    qkv = (jnp.dot(h1.astype(MATMUL_DTYPE), wqkv_ref[0],
                   preferred_element_type=jnp.float32) + bqkv_ref[0])
    q = qkv[:, :d_head]
    k = qkv[:, d_head:2 * d_head]
    v = qkv[:, 2 * d_head:]

    # Causal mask from iota.
    # TODO(synk): at large T add a kv-tile grid axis with flash-style online
    # softmax (m/l/acc scratch), derive the mask from tile indices and skip
    # fully-masked kv tiles instead of building the full (T, T) score matrix.
    row = jax.lax.broadcasted_iota(jnp.int32, (seq, seq), 0)
    col = jax.lax.broadcasted_iota(jnp.int32, (seq, seq), 1)

    s = jnp.dot(q.astype(MATMUL_DTYPE), k.T.astype(MATMUL_DTYPE),
                preferred_element_type=jnp.float32)
    s = jnp.where(col <= row, s, jnp.float32(_NEG_BIG))
    s = s - jnp.max(s, axis=-1, keepdims=True)
    p = jnp.exp(s)
    # exact reciprocal for f32 parity; approx=True routes it to the EUP slot.
    p = p * pl.reciprocal(jnp.sum(p, axis=-1, keepdims=True), approx=False)

    o_h = jnp.dot(p.astype(MATMUL_DTYPE), v.astype(MATMUL_DTYPE),
                  preferred_element_type=jnp.float32)
    # concat-over-heads + big projection == sum over heads of per-head (Dh, C)
    # projections: accumulate straight into the resident output block.
    o_ref[0] += jnp.dot(o_h.astype(MATMUL_DTYPE), wattn_ref[0],
                        preferred_element_type=jnp.float32)


# -------------------------------- MLP kernel ---------------------------------

def _mlp_kernel(x_ref, ln2_w_ref, ln2_b_ref, wfc_ref, bfc_ref,
                wmlp_ref, bmlp_ref, o_ref):
    """One row-tile of  out = x + proj(gelu(fc(ln2(x))))."""
    x = x_ref[...]                                           # (rows, C)
    mu = jnp.mean(x, axis=-1, keepdims=True)
    var = jnp.mean((x - mu) ** 2, axis=-1, keepdims=True)
    h2 = (x - mu) * jax.lax.rsqrt(var + _EPS) * ln2_w_ref[...] + ln2_b_ref[...]

    # TODO(synk): at GPT scale, K-tile the (C, 4C)/(4C, C) weights over an
    # extra 'arbitrary' grid axis so the weight blocks also fit small VMEM.
    ff = (jnp.dot(h2.astype(MATMUL_DTYPE), wfc_ref[...],
                  preferred_element_type=jnp.float32) + bfc_ref[...])
    ff = 0.5 * ff * (1.0 + jax.lax.erf(ff * (1.0 / math.sqrt(2.0))))   # exact GELU
    o_ref[...] = (x + jnp.dot(ff.astype(MATMUL_DTYPE), wmlp_ref[...],
                              preferred_element_type=jnp.float32)
                  + bmlp_ref[...])


# ------------------------- host-side weight preparation ----------------------

def prepare_block_params(p, n_heads, matmul_dtype=MATMUL_DTYPE):
    """One-time host transform of 'PyTorch-layout' params into kernel layout."""
    C = p["wqkv"].shape[0]
    Dh = C // n_heads
    scale = 1.0 / math.sqrt(Dh)

    wq, wk, wv = p["wqkv"][:, :C], p["wqkv"][:, C:2 * C], p["wqkv"][:, 2 * C:]
    bq, bk, bv = p["bqkv"][:, :C], p["bqkv"][:, C:2 * C], p["bqkv"][:, 2 * C:]

    def cols_per_head(w):                  # (C, C) -> (H, C, Dh)
        return jnp.transpose(w.reshape(C, n_heads, Dh), (1, 0, 2))

    def bias_per_head(b):                  # (1, C) -> (H, 1, Dh)
        return jnp.transpose(b.reshape(1, n_heads, Dh), (1, 0, 2))

    # Fused per-head [Q*scale | K | V] -> (H, C, 3*Dh) / (H, 1, 3*Dh)
    wqkv_h = jnp.concatenate(
        [cols_per_head(wq) * scale, cols_per_head(wk), cols_per_head(wv)], axis=-1)
    bqkv_h = jnp.concatenate(
        [bias_per_head(bq) * scale, bias_per_head(bk), bias_per_head(bv)], axis=-1)

    # TODO(synk): for C/Dh not multiples of 128, pad weights/activations to
    # 128 lanes (and mask LN/softmax statistics) for lane-dense stores.
    return {
        "ln1_w": p["ln1_w"], "ln1_b": p["ln1_b"],
        "wqkv_h": wqkv_h.astype(matmul_dtype),
        "bqkv_h": bqkv_h,
        "wattn_h": p["wattn"].reshape(n_heads, Dh, C).astype(matmul_dtype),
        "battn": p["battn"],
        "ln2_w": p["ln2_w"], "ln2_b": p["ln2_b"],
        "wfc": p["wfc"].astype(matmul_dtype), "bfc": p["bfc"],
        "wmlp": p["wmlp"].astype(matmul_dtype), "bmlp": p["bmlp"],
    }


# ------------------------------- helpers --------------------------------------

def _vmem_limit_bytes(in_blocks, out_blocks, scratch_bytes=0):
    """Scoped-VMEM request from the chosen block shapes (inputs/outputs are
    double-buffered by the pipeline); clamp to [32 MiB, 64 MiB] so it is safe
    on v5e/v6e (128 MiB physical) and v7x (64 MiB physical)."""
    total = scratch_bytes
    for shape, dtype in list(in_blocks) + list(out_blocks):
        total += 2 * math.prod(shape) * jnp.dtype(dtype).itemsize
    total = int(total * 1.5) + (2 << 20)          # headroom for compiler temps
    return max(32 << 20, min(total, 64 << 20))


def _pick_row_tile(bt):
    """Largest multiple-of-8 row tile dividing bt that still leaves >=2 grid
    steps when possible (so the pipeline actually overlaps DMA and compute)."""
    for t in (512, 256, 128, 64, 32, 16, 8):
        if bt % t == 0 and t <= max(8, bt // 2):
            return t
    return bt


# -------------------------------- wrapper --------------------------------------

def block_forward(x, kp, n_heads):
    """x: (B, T, C) float32. Returns (B, T, C)."""
    B, T, C = x.shape
    Dh = C // n_heads
    f32 = jnp.float32

    # ---------------- attention + first residual:  x1 = x + attn(ln1(x)) ------
    attn_vmem = _vmem_limit_bytes(
        in_blocks=[((1, T, C), f32), ((1, C), f32), ((1, C), f32),
                   ((1, C, 3 * Dh), MATMUL_DTYPE), ((1, 1, 3 * Dh), f32),
                   ((1, Dh, C), MATMUL_DTYPE), ((1, C), f32)],
        out_blocks=[((1, T, C), f32)],
        scratch_bytes=T * C * 4 + 4 * T * T * 4)   # h1 scratch + score temporaries

    x1 = pl.pallas_call(
        functools.partial(_attn_kernel, T, Dh),
        grid=(B, n_heads),                          # head axis = reduction, last
        in_specs=[
            pl.BlockSpec((1, T, C), lambda b, h: (b, 0, 0)),        # x
            pl.BlockSpec((1, C), lambda b, h: (0, 0)),              # ln1_w
            pl.BlockSpec((1, C), lambda b, h: (0, 0)),              # ln1_b
            pl.BlockSpec((1, C, 3 * Dh), lambda b, h: (h, 0, 0)),   # fused qkv w
            pl.BlockSpec((1, 1, 3 * Dh), lambda b, h: (h, 0, 0)),   # fused qkv b
            pl.BlockSpec((1, Dh, C), lambda b, h: (h, 0, 0)),       # out-proj rows
            pl.BlockSpec((1, C), lambda b, h: (0, 0)),              # battn
        ],
        out_specs=pl.BlockSpec((1, T, C), lambda b, h: (b, 0, 0)),  # resident over h
        out_shape=jax.ShapeDtypeStruct((B, T, C), jnp.float32),
        scratch_shapes=[pltpu.VMEM((T, C), jnp.float32)],           # ln1(x) per batch
        compiler_params=pltpu.CompilerParams(
            dimension_semantics=("parallel", "arbitrary"),
            vmem_limit_bytes=attn_vmem),
    )(x, kp["ln1_w"], kp["ln1_b"], kp["wqkv_h"], kp["bqkv_h"],
      kp["wattn_h"], kp["battn"])

    # ---------------- MLP + second residual:  out = x1 + mlp(ln2(x1)) ---------
    BT = B * T
    rows = _pick_row_tile(BT)
    x1f = x1.reshape(BT, C)                         # fold batch into sublanes (free)

    mlp_vmem = _vmem_limit_bytes(
        in_blocks=[((rows, C), f32), ((1, C), f32), ((1, C), f32),
                   ((C, 4 * C), MATMUL_DTYPE), ((1, 4 * C), f32),
                   ((4 * C, C), MATMUL_DTYPE), ((1, C), f32)],
        out_blocks=[((rows, C), f32)],
        scratch_bytes=rows * 4 * C * 4)             # ff intermediate

    out = pl.pallas_call(
        _mlp_kernel,
        grid=(BT // rows,),
        in_specs=[
            pl.BlockSpec((rows, C), lambda i: (i, 0)),      # x1 tile
            pl.BlockSpec((1, C), lambda i: (0, 0)),         # ln2_w
            pl.BlockSpec((1, C), lambda i: (0, 0)),         # ln2_b
            pl.BlockSpec((C, 4 * C), lambda i: (0, 0)),     # wfc
            pl.BlockSpec((1, 4 * C), lambda i: (0, 0)),     # bfc
            pl.BlockSpec((4 * C, C), lambda i: (0, 0)),     # wmlp
            pl.BlockSpec((1, C), lambda i: (0, 0)),         # bmlp
        ],
        out_specs=pl.BlockSpec((rows, C), lambda i: (i, 0)),
        out_shape=jax.ShapeDtypeStruct((BT, C), jnp.float32),
        compiler_params=pltpu.CompilerParams(
            dimension_semantics=("parallel",),
            vmem_limit_bytes=mlp_vmem),
    )(x1f, kp["ln2_w"], kp["ln2_b"], kp["wfc"], kp["bfc"],
      kp["wmlp"], kp["bmlp"])

    return out.reshape(B, T, C)


# ---------------------------- reference (plain JAX) ---------------------------

def block_reference(x, p, n_heads):
    B, T, C = x.shape
    Dh = C // n_heads
    hi = jax.lax.Precision.HIGHEST

    def ln(v, w, b):
        mu = jnp.mean(v, axis=-1, keepdims=True)
        var = jnp.mean((v - mu) ** 2, axis=-1, keepdims=True)
        return (v - mu) / jnp.sqrt(var + _EPS) * w + b

    h1 = ln(x, p["ln1_w"], p["ln1_b"])
    qkv = jnp.einsum("btc,cd->btd", h1, p["wqkv"], precision=hi) + p["bqkv"]
    q, k, v = jnp.split(qkv, 3, axis=-1)
    q = q.reshape(B, T, n_heads, Dh).transpose(0, 2, 1, 3)
    k = k.reshape(B, T, n_heads, Dh).transpose(0, 2, 1, 3)
    v = v.reshape(B, T, n_heads, Dh).transpose(0, 2, 1, 3)
    s = jnp.einsum("bhqd,bhkd->bhqk", q, k, precision=hi) / math.sqrt(Dh)
    mask = jnp.tril(jnp.ones((T, T), bool))
    s = jnp.where(mask, s, -jnp.inf)
    att = jax.nn.softmax(s, axis=-1)
    y = jnp.einsum("bhqk,bhkd->bhqd", att, v, precision=hi)
    y = y.transpose(0, 2, 1, 3).reshape(B, T, C)
    x1 = x + jnp.einsum("btc,cd->btd", y, p["wattn"], precision=hi) + p["battn"]

    h2 = ln(x1, p["ln2_w"], p["ln2_b"])
    ff = jnp.einsum("btc,cd->btd", h2, p["wfc"], precision=hi) + p["bfc"]
    ff = 0.5 * ff * (1.0 + jax.lax.erf(ff / math.sqrt(2.0)))
    return x1 + jnp.einsum("btc,cd->btd", ff, p["wmlp"], precision=hi) + p["bmlp"]


# --------------------------------- main ---------------------------------------

if __name__ == "__main__":
    # Small GPT-block config: embed_dim=32, heads=4, seq=8, batch=2, bias=True,
    # dropout=0.0 (eval).
    Bsz, T, C, H = 2, 8, 32, 4
    keys = jax.random.split(jax.random.PRNGKey(0), 9)

    def linear_w(k, fan_in, fan_out):
        bound = 1.0 / math.sqrt(fan_in)
        return jax.random.uniform(k, (fan_in, fan_out), jnp.float32, -bound, bound)

    params = {
        "ln1_w": jnp.ones((1, C), jnp.float32),
        "ln1_b": jnp.zeros((1, C), jnp.float32),
        "wqkv": linear_w(keys[0], C, 3 * C),
        "bqkv": jax.random.uniform(keys[1], (1, 3 * C), jnp.float32,
                                   -1 / math.sqrt(C), 1 / math.sqrt(C)),
        "wattn": linear_w(keys[2], C, C),
        "battn": jax.random.uniform(keys[3], (1, C), jnp.float32,
                                    -1 / math.sqrt(C), 1 / math.sqrt(C)),
        "ln2_w": jnp.ones((1, C), jnp.float32),
        "ln2_b": jnp.zeros((1, C), jnp.float32),
        "wfc": linear_w(keys[4], C, 4 * C),
        "bfc": jax.random.uniform(keys[5], (1, 4 * C), jnp.float32,
                                  -1 / math.sqrt(C), 1 / math.sqrt(C)),
        "wmlp": linear_w(keys[6], 4 * C, C),
        "bmlp": jax.random.uniform(keys[7], (1, C), jnp.float32,
                                   -1 / math.sqrt(4 * C), 1 / math.sqrt(4 * C)),
    }
    x = jax.random.normal(keys[8], (Bsz, T, C), jnp.float32)

    kernel_params = prepare_block_params(params, H)     # one-time host transform
    out = block_forward(x, kernel_params, H)
    out = jax.block_until_ready(out)

    ref = block_reference(x, params, H)
    assert out.shape == (Bsz, T, C)
    assert jnp.allclose(out, ref, atol=1e-3, rtol=1e-3), (
        f"max abs err {jnp.max(jnp.abs(out - ref))}")

    print("KERNEL_OK")
</pallas_src>

<mosaic_0001>
module attributes {stable_mosaic.version = 11 : i64} {
  func.func @_attn_kernel(%arg0: i32, %arg1: i32, %arg2: memref<1x8x32xf32, #tpu.memory_space<vmem>>, %arg3: memref<1x32xf32, #tpu.memory_space<vmem>>, %arg4: memref<1x32xf32, #tpu.memory_space<vmem>>, %arg5: memref<1x32x24xf32, #tpu.memory_space<vmem>>, %arg6: memref<1x1x24xf32, #tpu.memory_space<vmem>>, %arg7: memref<1x8x32xf32, #tpu.memory_space<vmem>>, %arg8: memref<1x32xf32, #tpu.memory_space<vmem>>, %arg9: memref<1x8x32xf32, #tpu.memory_space<vmem>>, %arg10: memref<8x32xf32, #tpu.memory_space<vmem>>) attributes {dimension_semantics = [#tpu.dimension_semantics<parallel>, #tpu.dimension_semantics<arbitrary>], iteration_bounds = array<i64: 2, 4>, scalar_prefetch = 0 : i64, scratch_operands = 1 : i64, tpu.core_type = #tpu.core_type<tc>, window_params = [{transform_indices = @transform_0, window_bounds = array<i64: 1, 8, 32>}, {pipeline_mode = #tpu.pipeline_mode<synchronous>, transform_indices = @transform_1, window_bounds = array<i64: 1, 32>}, {pipeline_mode = #tpu.pipeline_mode<synchronous>, transform_indices = @transform_2, window_bounds = array<i64: 1, 32>}, {transform_indices = @transform_3, window_bounds = array<i64: 1, 32, 24>}, {transform_indices = @transform_4, window_bounds = array<i64: 1, 1, 24>}, {transform_indices = @transform_5, window_bounds = array<i64: 1, 8, 32>}, {pipeline_mode = #tpu.pipeline_mode<synchronous>, transform_indices = @transform_6, window_bounds = array<i64: 1, 32>}, {transform_indices = @transform_7, window_bounds = array<i64: 1, 8, 32>}]} {
    %c0_i32 = arith.constant 0 : i32
    %0 = arith.cmpi eq, %arg1, %c0_i32 : i32
    %1 = arith.extui %0 : i1 to i32
    %c0_i32_0 = arith.constant 0 : i32
    %2 = arith.cmpi ne, %1, %c0_i32_0 : i32
    scf.if %2 {
      %c0_23 = arith.constant 0 : index
      %c0_24 = arith.constant 0 : index
      %c0_25 = arith.constant 0 : index
      %41 = vector.load %arg2[%c0_23, %c0_24, %c0_25] : memref<1x8x32xf32, #tpu.memory_space<vmem>>, vector<1x8x32xf32>
      %42 = vector.shape_cast %41 : vector<1x8x32xf32> to vector<8x32xf32>
      %cst_26 = arith.constant dense<0.000000e+00> : vector<8xf32>
      %43 = vector.multi_reduction <add>, %42, %cst_26 [1] : vector<8x32xf32> to vector<8xf32>
      %44 = vector.shape_cast %43 : vector<8xf32> to vector<8x1xf32>
      %cst_27 = arith.constant 3.200000e+01 : f32
      %45 = vector.broadcast %cst_27 : f32 to vector<8x1xf32>
      %46 = arith.divf %44, %45 : vector<8x1xf32>
      %47 = vector.broadcast %46 : vector<8x1xf32> to vector<8x32xf32>
      %48 = arith.subf %42, %47 : vector<8x32xf32>
      %49 = arith.mulf %48, %48 : vector<8x32xf32>
      %cst_28 = arith.constant dense<0.000000e+00> : vector<8xf32>
      %50 = vector.multi_reduction <add>, %49, %cst_28 [1] : vector<8x32xf32> to vector<8xf32>
      %51 = vector.shape_cast %50 : vector<8xf32> to vector<8x1xf32>
      %cst_29 = arith.constant 3.200000e+01 : f32
      %52 = vector.broadcast %cst_29 : f32 to vector<8x1xf32>
      %53 = arith.divf %51, %52 : vector<8x1xf32>
      %54 = vector.broadcast %46 : vector<8x1xf32> to vector<8x32xf32>
      %55 = arith.subf %42, %54 : vector<8x32xf32>
      %cst_30 = arith.constant 9.99999974E-6 : f32
      %56 = vector.broadcast %cst_30 : f32 to vector<8x1xf32>
      %57 = arith.addf %53, %56 : vector<8x1xf32>
      %58 = math.rsqrt %57 : vector<8x1xf32>
      %59 = vector.broadcast %58 : vector<8x1xf32> to vector<8x32xf32>
      %60 = arith.mulf %55, %59 : vector<8x32xf32>
      %c0_31 = arith.constant 0 : index
      %c0_32 = arith.constant 0 : index
      %61 = vector.load %arg3[%c0_31, %c0_32] : memref<1x32xf32, #tpu.memory_space<vmem>>, vector<1x32xf32>
      %62 = vector.broadcast %61 : vector<1x32xf32> to vector<8x32xf32>
      %63 = arith.mulf %60, %62 : vector<8x32xf32>
      %c0_33 = arith.constant 0 : index
      %c0_34 = arith.constant 0 : index
      %64 = vector.load %arg4[%c0_33, %c0_34] : memref<1x32xf32, #tpu.memory_space<vmem>>, vector<1x32xf32>
      %65 = vector.broadcast %64 : vector<1x32xf32> to vector<8x32xf32>
      %66 = arith.addf %63, %65 : vector<8x32xf32>
      %c0_35 = arith.constant 0 : index
      %c0_36 = arith.constant 0 : index
      %67 = vector.load %arg10[%c0_35, %c0_36] : memref<8x32xf32, #tpu.memory_space<vmem>>, vector<8x32xf32>
      tpu.vector_store %arg10[%c0_35, %c0_36], %66 {strides = array<i32>} : memref<8x32xf32, #tpu.memory_space<vmem>>, vector<8x32xf32>,
      %c0_37 = arith.constant 0 : index
      %c0_38 = arith.constant 0 : index
      %68 = vector.load %arg8[%c0_37, %c0_38] : memref<1x32xf32, #tpu.memory_space<vmem>>, vector<1x32xf32>
      %69 = vector.broadcast %68 : vector<1x32xf32> to vector<8x32xf32>
      %70 = arith.addf %42, %69 : vector<8x32xf32>
      %c0_39 = arith.constant 0 : index
      %c0_40 = arith.constant 0 : index
      %c0_41 = arith.constant 0 : index
      %71 = vector.load %arg9[%c0_39, %c0_40, %c0_41] : memref<1x8x32xf32, #tpu.memory_space<vmem>>, vector<1x8x32xf32>
      %72 = vector.shape_cast %71 : vector<1x8x32xf32> to vector<8x32xf32>
      %73 = vector.shape_cast %70 : vector<8x32xf32> to vector<1x8x32xf32>
      tpu.vector_store %arg9[%c0_39, %c0_40, %c0_41], %73 {strides = array<i32>} : memref<1x8x32xf32, #tpu.memory_space<vmem>>, vector<1x8x32xf32>,
    } else {
    }
    %c0 = arith.constant 0 : index
    %c0_1 = arith.constant 0 : index
    %3 = vector.load %arg10[%c0, %c0_1] : memref<8x32xf32, #tpu.memory_space<vmem>>, vector<8x32xf32>
    %c0_2 = arith.constant 0 : index
    %c0_3 = arith.constant 0 : index
    %c0_4 = arith.constant 0 : index
    %4 = vector.load %arg5[%c0_2, %c0_3, %c0_4] : memref<1x32x24xf32, #tpu.memory_space<vmem>>, vector<1x32x24xf32>
    %5 = vector.shape_cast %4 : vector<1x32x24xf32> to vector<32x24xf32>
    %cst = arith.constant dense<0.000000e+00> : vector<8x24xf32>
    %6 = tpu.matmul %3, %5, %cst {dimension_numbers = #tpu.dot_dimension_numbers<[1], [0], [0], [1], [0, 0, 1, 1], [], []>} : vector<8x32xf32>, vector<32x24xf32>, vector<8x24xf32> -> vector<8x24xf32>
    %c0_5 = arith.constant 0 : index
    %c0_6 = arith.constant 0 : index
    %c0_7 = arith.constant 0 : index
    %7 = vector.load %arg6[%c0_5, %c0_6, %c0_7] : memref<1x1x24xf32, #tpu.memory_space<vmem>>, vector<1x1x24xf32>
    %8 = vector.shape_cast %7 : vector<1x1x24xf32> to vector<1x24xf32>
    %9 = vector.broadcast %8 : vector<1x24xf32> to vector<8x24xf32>
    %10 = arith.addf %6, %9 : vector<8x24xf32>
    %11 = vector.extract_strided_slice %10 {offsets = [0, 0], sizes = [8, 8], strides = [1, 1]} : vector<8x24xf32> to vector<8x8xf32>
    %12 = vector.extract_strided_slice %10 {offsets = [0, 8], sizes = [8, 8], strides = [1, 1]} : vector<8x24xf32> to vector<8x8xf32>
    %13 = vector.extract_strided_slice %10 {offsets = [0, 16], sizes = [8, 8], strides = [1, 1]} : vector<8x24xf32> to vector<8x8xf32>
    %14 = tpu.iota {dimensions = array<i32: 0>} : vector<8x8xi32>
    %15 = tpu.iota {dimensions = array<i32: 1>} : vector<8x8xi32>
    %16 = tpu.transpose %12, [1, 0] : vector<8x8xf32> -> vector<8x8xf32>
    %cst_8 = arith.constant dense<0.000000e+00> : vector<8x8xf32>
    %17 = tpu.matmul %11, %16, %cst_8 {dimension_numbers = #tpu.dot_dimension_numbers<[1], [0], [0], [1], [0, 0, 1, 1], [], []>} : vector<8x8xf32>, vector<8x8xf32>, vector<8x8xf32> -> vector<8x8xf32>
    %18 = arith.cmpi sle, %15, %14 : vector<8x8xi32>
    %cst_9 = arith.constant -1.000000e+30 : f32
    %19 = vector.broadcast %cst_9 : f32 to vector<8x8xf32>
    %20 = arith.select %18, %17, %19 : vector<8x8xi1>, vector<8x8xf32>
    %cst_10 = arith.constant dense<0xFF800000> : vector<8xf32>
    %21 = vector.multi_reduction <maximumf>, %20, %cst_10 [1] : vector<8x8xf32> to vector<8xf32>
    %22 = vector.shape_cast %21 : vector<8xf32> to vector<8x1xf32>
    %23 = vector.broadcast %22 : vector<8x1xf32> to vector<8x8xf32>
    %24 = arith.subf %20, %23 : vector<8x8xf32>
    %25 = math.exp %24 : vector<8x8xf32>
    %cst_11 = arith.constant dense<0.000000e+00> : vector<8xf32>
    %26 = vector.multi_reduction <add>, %25, %cst_11 [1] : vector<8x8xf32> to vector<8xf32>
    %27 = vector.shape_cast %26 : vector<8xf32> to vector<8x1xf32>
    %28 = tpu.reciprocal %27 : vector<8x1xf32> -> vector<8x1xf32>
    %29 = vector.broadcast %28 : vector<8x1xf32> to vector<8x8xf32>
    %30 = arith.mulf %25, %29 : vector<8x8xf32>
    %cst_12 = arith.constant dense<0.000000e+00> : vector<8x8xf32>
    %31 = tpu.matmul %30, %13, %cst_12 {dimension_numbers = #tpu.dot_dimension_numbers<[1], [0], [0], [1], [0, 0, 1, 1], [], []>} : vector<8x8xf32>, vector<8x8xf32>, vector<8x8xf32> -> vector<8x8xf32>
    %c0_13 = arith.constant 0 : index
    %c0_14 = arith.constant 0 : index
    %c0_15 = arith.constant 0 : index
    %32 = vector.load %arg9[%c0_13, %c0_14, %c0_15] : memref<1x8x32xf32, #tpu.memory_space<vmem>>, vector<1x8x32xf32>
    %33 = vector.shape_cast %32 : vector<1x8x32xf32> to vector<8x32xf32>
    %c0_16 = arith.constant 0 : index
    %c0_17 = arith.constant 0 : index
    %c0_18 = arith.constant 0 : index
    %34 = vector.load %arg7[%c0_16, %c0_17, %c0_18] : memref<1x8x32xf32, #tpu.memory_space<vmem>>, vector<1x8x32xf32>
    %35 = vector.shape_cast %34 : vector<1x8x32xf32> to vector<8x32xf32>
    %cst_19 = arith.constant dense<0.000000e+00> : vector<8x32xf32>
    %36 = tpu.matmul %31, %35, %cst_19 {dimension_numbers = #tpu.dot_dimension_numbers<[1], [0], [0], [1], [0, 0, 1, 1], [], []>} : vector<8x8xf32>, vector<8x32xf32>, vector<8x32xf32> -> vector<8x32xf32>
    %37 = arith.addf %33, %36 : vector<8x32xf32>
    %c0_20 = arith.constant 0 : index
    %c0_21 = arith.constant 0 : index
    %c0_22 = arith.constant 0 : index
    %38 = vector.load %arg9[%c0_20, %c0_21, %c0_22] : memref<1x8x32xf32, #tpu.memory_space<vmem>>, vector<1x8x32xf32>
    %39 = vector.shape_cast %38 : vector<1x8x32xf32> to vector<8x32xf32>
    %40 = vector.shape_cast %37 : vector<8x32xf32> to vector<1x8x32xf32>
    tpu.vector_store %arg9[%c0_20, %c0_21, %c0_22], %40 {strides = array<i32>} : memref<1x8x32xf32, #tpu.memory_space<vmem>>, vector<1x8x32xf32>,
    return
  }
  func.func @transform_0(%arg0: i32, %arg1: i32) -> (i32, i32, i32) {
    %c0_i32 = arith.constant 0 : i32
    %c0_i32_0 = arith.constant 0 : i32
    %c0_i32_1 = arith.constant 0 : i32
    return %arg0, %c0_i32, %c0_i32_0 : i32, i32, i32
  }
  func.func @transform_1(%arg0: i32, %arg1: i32) -> (i32, i32) {
    %c0_i32 = arith.constant 0 : i32
    %c0_i32_0 = arith.constant 0 : i32
    %c0_i32_1 = arith.constant 0 : i32
    return %c0_i32, %c0_i32_0 : i32, i32
  }
  func.func @transform_2(%arg0: i32, %arg1: i32) -> (i32, i32) {
    %c0_i32 = arith.constant 0 : i32
    %c0_i32_0 = arith.constant 0 : i32
    %c0_i32_1 = arith.constant 0 : i32
    return %c0_i32, %c0_i32_0 : i32, i32
  }
  func.func @transform_3(%arg0: i32, %arg1: i32) -> (i32, i32, i32) {
    %c0_i32 = arith.constant 0 : i32
    %c0_i32_0 = arith.constant 0 : i32
    %c0_i32_1 = arith.constant 0 : i32
    return %arg1, %c0_i32, %c0_i32_0 : i32, i32, i32
  }
  func.func @transform_4(%arg0: i32, %arg1: i32) -> (i32, i32, i32) {
    %c0_i32 = arith.constant 0 : i32
    %c0_i32_0 = arith.constant 0 : i32
    %c0_i32_1 = arith.constant 0 : i32
    return %arg1, %c0_i32, %c0_i32_0 : i32, i32, i32
  }
  func.func @transform_5(%arg0: i32, %arg1: i32) -> (i32, i32, i32) {
    %c0_i32 = arith.constant 0 : i32
    %c0_i32_0 = arith.constant 0 : i32
    %c0_i32_1 = arith.constant 0 : i32
    return %arg1, %c0_i32, %c0_i32_0 : i32, i32, i32
  }
  func.func @transform_6(%arg0: i32, %arg1: i32) -> (i32, i32) {
    %c0_i32 = arith.constant 0 : i32
    %c0_i32_0 = arith.constant 0 : i32
    %c0_i32_1 = arith.constant 0 : i32
    return %c0_i32, %c0_i32_0 : i32, i32
  }
  func.func @transform_7(%arg0: i32, %arg1: i32) -> (i32, i32, i32) {
    %c0_i32 = arith.constant 0 : i32
    %c0_i32_0 = arith.constant 0 : i32
    %c0_i32_1 = arith.constant 0 : i32
    return %arg0, %c0_i32, %c0_i32_0 : i32, i32, i32
  }
}

</mosaic_0001>

<bundles_post_ra>
// kernel: tpu_custom_call.1
= control target key start
LH: loop header
LB: loop body
LE: loop exit
PB: predicated region body
PF: predicated region fallthrough
CT: control target
= control target key end

     0   :  { %12 = vsyncpa [#allocation4], 0  ;;  %s1307_s0 = inlined_call_operand.vmem [shape: f32[2,8,32], index: 0, kind: input, shape index: {}]   ;;  %s1308_s1 = inlined_call_operand.vmem [shape: f32[1,32], index: 1, kind: input, shape index: {}]   ;;  %s1309_s2 = inlined_call_operand.vmem [shape: f32[1,32], index: 2, kind: input, shape index: {}]   ;;  %s1310_s3 = inlined_call_operand.vmem [shape: f32[4,32,24], index: 3, kind: input, shape index: {}]   ;;  %s1311_s4 = inlined_call_operand.vmem [shape: f32[4,1,24], index: 4, kind: input, shape index: {}]   ;;  %s1312_s5 = inlined_call_operand.vmem [shape: f32[4,8,32], index: 5, kind: input, shape index: {}]   ;;  %s1313_s6 = inlined_call_operand.vmem [shape: f32[1,32], index: 6, kind: input, shape index: {}]   ;;  %s1314_s7 = inlined_call_operand.hbm [shape: f32[2,8,32], index: 7, kind: output, shape index: {}]  }
   0x1   :  { %14 = vsyncpa [#allocation4 + $0x1], 0  ;;  %s1116_s24 = smov 0   ;;  %s1118_s25 = smov 0  }
   0x2   :  { %s1120_s26 = smov 0   ;;  %s1122_s27 = smov 0  }
   0x3   :  { %s1124_s28 = smov 0   ;;  %s1126_s29 = smov 0  }
   0x4   :  { %s1128_s30 = smov 0   ;;  %s1130_s8 = smov 0  }
   0x5 LB: > { %1322 = sst [smem:[#allocation6_spill]] %s1041_s24  ;;  %s834_s9 = sadd.s32 4294967295, %s1069_s8   ;;  %s1069_s8 = sphi %s1130_s8, %s20_s8   ;;  %s1065_s30 = sphi %s1128_s30, %s1340_s30   ;;  %s1061_s29 = sphi %s1126_s29, %s1339_s29   ;;  %s1057_s28 = sphi %s1124_s28, %s1338_s28   ;;  %s1053_s27 = sphi %s1122_s27, %s1337_s27   ;;  %s1049_s26 = sphi %s1120_s26, %s1336_s26   ;;  %s1045_s25 = sphi %s1118_s25, %s1342_s25   ;;  %s1041_s24 = sphi %s1116_s24, %s1341_s24  }
   0x6   : > { %1323 = sst [smem:[#allocation7_spill]] %s1049_s26  ;;  %s835_s10 = sadd.s32 4294967294, %s1069_s8  }
   0x7   : > { %1324 = sst [smem:[#allocation8_spill]] %s1061_s29  ;;  %s29_s11 = sadd.s32 1, %s1061_s29 }
   0x8   : > { %1325 = sst [smem:[#allocation9_spill]] %s1065_s30  ;;  %p30_p0 = scmp.ge.s32.totalorder %s29_s11, 4 }
   0x9   : > { %s32_s12 = sadd.s32 1, %s1065_s30  ;;  %p216_p1 = scmp.ne.s32.totalorder %s1049_s26, %s1045_s25 }
   0xa   : > { %p217_p2 = scmp.eq.s32.totalorder %s834_s9, 7  ;;  %s1344_s11 = smov (%p30_p0, %s29_s11), 0 }
   0xb   : > { %1326 = sst [smem:[#allocation10_spill]] %s1344_s11  ;;  %s1346_s12 = smov (!%p30_p0, %s32_s12), %s1065_s30 }
   0xc   : > { %p1165_p3 = por %p217_p2, %p216_p1  ;;  %p222_p4 = scmp.ne.s32.totalorder %s1045_s25, %s1041_s24 }
   0xd   : > { %p34_p5 = scmp.ge.s32.totalorder %s1346_s12, 2  ;;  %p223_p6 = scmp.eq.s32.totalorder %s835_s10, 7 }
   0xe   : > { %p838_p7 = scmp.ge.s32.totalorder %s1069_s8, 1  ;;  %p278_p8 = scmp.lt.s32.totalorder %s1069_s8, 9 }
   0xf   : > { %s1348_s12 = smov (%p34_p5, %s1346_s12), 0  ;;  %p1175_p9 = por %p223_p6, %p222_p4 }
  0x10   : > { %1328 = sst [smem:[#allocation11_spill]] %s1348_s12  ;;  %p279_p10 = pnand %p838_p7, %p278_p8 }
  0x11   : > { %s1329_s14 = scalar_select %p1175_p9, 1, 0 }
  0x12   : > { %s203_s15 = ssub.s32 %s1065_s30, %s1348_s12  ;;  %s206_s16 = sadd.s32 1, %s1049_s26 }
  0x13   : > { %1330 = sst [smem:[#allocation12_spill]] %s1329_s14  ;;  %p204_p11 = scmp.eq.s32.totalorder %s203_s15, 0 }
  0x14   : > { %282 = sbr.rel (%p279_p10) target bundleno = 1574 (0x626), region = 48  ;;  %s1317_s18 = sand.u32 (!%p279_p10), 1, %s1045_s25  }
  0x15   : > { %s1183_s17 = scalar_select %p204_p11, %s1049_s26, %s206_s16  }
  0x16   : > { %p321_p12 = scmp.lt.s32.totalorder (!%p279_p10), %s1057_s28, 1  ;;  %s839_s19 = sshll.u32 (!%p279_p10), %s1317_s18, 3 }
  0x17   : > { %1331 = sst [smem:[#allocation13_spill]] %s1183_s17  ;;  %p325_p13 = scmp.lt.s32.totalorder (!%p279_p10), %s1053_s27, 3 }
  0x18   : > { %p844_p0 = scmp.ne.s32.totalorder (!%p279_p10), %s1053_s27, 0 }
  0x19   : > { %s322_s20 = scalar_select %p321_p12, %s1057_s28, 1 }
  0x1a   : > { %s1192_s21 = scalar_select %p325_p13, %s1053_s27, 3 }
  0x1b   : > { %s840_s22 = sshll.u32 %s322_s20, 3  ;;  %s1213_s20 = scalar_lea.vmem [#allocation3], %s839_s19 }
  0x1c   : > { %s324_s10 = scalar_lea.vmem %s1307_s0, %s840_s22  ;;  %s858_s15 = sshll.u32 %s1192_s21, 5 }
  0x1d   : > { %s1201_s11 = scalar_lea.vmem %s1310_s3, %s858_s15  ;;  %s332_s29 = scalar_lea.vmem %s1311_s4, %s1192_s21 }
  0x1e   : > { %s843_s17 = sshll.u32 %s1192_s21, 3  ;;  %340 = sbr.rel (%p844_p0) target bundleno = 345 (0x159), region = 52 }
  0x1f   : > { %s1211_s24 = scalar_lea.vmem %s1312_s5, %s843_s17 }
  0x23   : > { %v341_v0 = vld [vmem:[%s324_s10] sm:$0xff]  ;;  %vm342_vm0 = vcmask 261120  }
  0x24   : > { %v847_v1 = vld [vmem:[%s1313_s6] ss:$0 sm:$0xff]  ;;  %v343_v2 = vsel %vm342_vm0, %v341_v0, 0.0 }
  0x25   : > { %v381_v3 = vadd.f32 %v847_v1, %v341_v0  ;;  %344 = vadd.xlane.f32.xlu0 %v343_v2  ;;  %v845_v13 = vld [vmem:[%s1308_s1] ss:$0 sm:$0xff] }
  0x26   : > { %v846_v15 = vld [vmem:[%s1309_s2] ss:$0 sm:$0xff] }
  0x27   : > { %382 = vst.msk [vmem:[%s1213_s20] sm:$0xff] %vm342_vm0, %v381_v3 }
  0xae   : > { %v345_v4 = vpop.xlane.xlu0 %344 }
  0xaf   : > { %v347_v5 = vmul.f32 0.03125, %v345_v4 }
  0xb1   : > { %v348_v6 = vsub.f32 %v341_v0, %v347_v5 }
  0xb3   : > { %v349_v7 = vmul.f32 %v348_v6, %v348_v6 }
  0xb5   : > { %v350_v8 = vsel %vm342_vm0, %v349_v7, 0.0 }
  0xb6   : > { %351 = vadd.xlane.f32.xlu0 %v350_v8 }
 0x13f   : > { %v352_v9 = vpop.xlane.xlu0 %351 }
 0x140   : > { %v353_v10 = vmul.f32 0.03125, %v352_v9 }
 0x142   : > { %v354_v11 = vadd.f32 1e-05, %v353_v10 }
 0x144   : > { %971 = vrsqrt.f32 %v354_v11 }
 0x151   : > { %v972_v12 = vpop.eup %971 }
 0x152   : > { %v356_v14 = vmul.f32 %v972_v12, %v348_v6 }
 0x154   : > { %v364_v16 = vmul.f32 %v845_v13, %v356_v14 }
 0x156   : > { %v372_v17 = vadd.f32 %v846_v15, %v364_v16 }
 0x158   : > { %373 = vst.msk [vmem:[#allocation2] sm:$0xff] %vm342_vm0, %v372_v17 }
 0x159 PF: > { %v387_v18 = vld [vmem:[%s1201_s11 + $0x18] sm:$0xff]  ;;  %v1071_v19 = vmov 0.0   ;;  %v386_v20 = vld [vmem:[%s1201_s11 + $0x10] sm:$0xff]  ;;  %vm1072_vm1 = vmmov 0   ;;  %v385_v21 = vld [vmem:[%s1201_s11 + $0x8] sm:$0xff]  ;;  %vm395_vm2 = vcmask 261120   ;;  %v469_v29 = vlaneseq }
 0x15a   : > { %870 = vmatprep.subr.mxu0 %v1071_v19  ;;  %878 = vmatprep.mubr.msk.f32.mxu0 %vm1072_vm1, %v1071_v19  ;;  %v384_v22 = vld [vmem:[%s1201_s11] sm:$0xff]  ;;  %s1073_s19 = smov 120   ;;  %vm476_vm3 = vcmask 64512   ;;  %v640_v48 = vld [vmem:[%s1213_s20] sm:$0xff]  ;;  %s855_s11 = sshll.u32 %s1057_s28, 7 }
 0x15b   : > { %871 = vmatpush3.msra.mxu0 %v387_v18  ;;  %881 = vmatprep.subr.mxu1 %v1071_v19  ;;  %v848_v24 = vld [vmem:[%s332_s29] ss:$0 sm:$0xff]  ;;  %v470_v30 = vshrl.u32 %v469_v29, 7  ;;  %v472_v31 = vand.u32 127, %v469_v29  ;;  %s1074_s29 = smov 112   ;;  %s731_s21 = sshll.u32 %s1213_s20, 4  ;;  %s732_s21 = int_to_ptr.vmem [resolvable:$true] %s731_s21 }
 0x15c   : > { %872 = vmatprep.subr.mxu0 %v1071_v19  ;;  %883 = vmatprep.mubr.msk.f32.mxu1 %vm1072_vm1, %v1071_v19  ;;  %v641_v41 = vld [vmem:[%s1211_s24] sm:$0xff]  ;;  %s1257_s9 = scalar_lea.hbm %s1314_s7, %s855_s11  ;;  %s1332_s10 = sand.u32 1, %s1045_s25  }
 0x15d   : > { %873 = vmatpush3.msra.mxu0 %v386_v20  ;;  %vm551_vm4 = vcmp.le.s32.totalorder %v472_v31, %v470_v30  ;;  %s718_s15 = scalar_lea.sflag [#allocation4], %s1332_s10  ;;  %s977_s16 = scalar_lea.vmem %s732_s21, 128 }
 0x15e   : > { %874 = vmatprep.subr.mxu0 %v1071_v19  ;;  %p978_p1 = scmp.ne.s32.totalorder %s732_s21, %s977_s16  ;;  %s1075_s28 = smov [#allocation3]  }
 0x15f   : > { %875 = vmatpush3.msra.mxu0 %v385_v21  ;;  %v383_v23 = vld [vmem:[#allocation2] sm:$0xff]  ;;  %s981_s12 = sshll.u32 %s1075_s28, 4  ;;  %s982_s12 = int_to_ptr.vmem [resolvable:$false] %s981_s12 }
 0x160   : > { %876 = vmatprep.subr.mxu0 %v1071_v19  ;;  %p979_p2 = pnand %p978_p1, %p1165_p3  ;;  %s983_s22 = scalar_lea.vmem %s982_s12, 256 }
 0x161   : > { %877 = vmatpush3.msra.mxu0 %v384_v22  ;;  %p984_p5 = scmp.lt.s32.totalorder %s732_s21, %s982_s12  ;;  %p985_p6 = scmp.lt.s32.totalorder %s983_s22, %s977_s16 }
 0x162   : > { %879 = vmatmul.mubr.msk.f32.vlgmr.msra.gmra.mxu0 %vm395_vm2, %v383_v23  ;;  %891 = vmatprep.subr.mxu0 %v1071_v19  ;;  %p980_p4 = pneg %p979_p2 }
 0x163   : > { %893 = vmatprep.mubr.msk.f32.mxu0 %vm1072_vm1, %v1071_v19  ;;  %892 = vmatpush3.msra.mxu0 %v641_v41  ;;  %p986_p7 = por %p985_p6, %p984_p5 }
 0x165   : > { %p987_p8 = pnand %p986_p7, %p980_p4 }
 0x222   : > { %v465_v25 = vpop.f32.mrf.mxu0 }
 0x223   : > { %v466_v26 = vadd.f32 %v848_v24, %v465_v25 }
 0x224   : > { %v880_v27 = vpop.f32.mrf.mxu0 }
 0x225   : > { %474 = vrot.lane.b32.xlu0 %v466_v26, %s1073_s19 }
 0x297   : > { %v475_v28 = vpop.permute.xlu0 %474 }
 0x298   : > { %882 = vmatpush3.xpose.msk.msra.mxu1 %vm476_vm3, %v475_v28 }
 0x299   : > { %886 = vmatprep.subr.mxu1 %v1071_v19 }
 0x29b   : > { %884 = vmatmul.mubr.msk.f32.vlgmr.msra.gmra.mxu1 %vm476_vm3, %v466_v26 }
 0x29c   : > { %888 = vmatprep.mubr.msk.f32.mxu1 %vm1072_vm1, %v1071_v19 }
 0x35b   : > { %v547_v32 = vpop.f32.mrf.mxu1 }
 0x35c   : > { %v552_v33 = vsel %vm551_vm4, %v547_v32, -1e+30 }
 0x35d   : > { %v885_v34 = vpop.f32.mrf.mxu1  ;;  %v553_v35 = vsel %vm476_vm3, %v552_v33, -inf }
 0x35e   : > { %554 = vmax.xlane.f32.xlu0 %v553_v35 }
 0x3e7   : > { %v555_v36 = vpop.xlane.xlu0 %554 }
 0x3e8   : > { %v556_v37 = vsub.f32 %v552_v33, %v555_v36 }
 0x3ea   : > { %v557_v38 = vmul.f32 1.442695, %v556_v37 }
 0x3ec   : > { %973 = vpow2.f32 %v557_v38 }
 0x3f9   : > { %v974_v39 = vpop.eup %973 }
 0x3fa   : > { %v559_v40 = vsel %vm476_vm3, %v974_v39, 0.0 }
 0x3fb   : > { %560 = vadd.xlane.f32.xlu1 %v559_v40 }
 0x40c   : > { %564 = vrot.lane.b32.xlu1 %v466_v26, %s1074_s29 }
 0x484   : > { %v561_v42 = vpop.xlane.xlu1 %560 }
 0x485   : > { %975 = vrcp.f32 %v561_v42 }
 0x488   : > { %v565_v43 = vpop.permute.xlu1 %564 }
 0x489   : > { %887 = vmatpush3.msra.mxu1 %v565_v43 }
 0x492   : > { %v976_v44 = vpop.eup %975 }
 0x493   : > { %v563_v45 = vmul.f32 %v976_v44, %v974_v39 }
 0x495   : > { %889 = vmatmul.mubr.msk.f32.vlgmr.msra.gmra.mxu1 %vm476_vm3, %v563_v45 }
 0x555   : > { %v636_v46 = vpop.f32.mrf.mxu1 }
 0x556   : > { %894 = vmatmul.mubr.msk.f32.vlgmr.msra.gmra.mxu0 %vm476_vm3, %v636_v46 }
 0x557   : > { %v890_v47 = vpop.f32.mrf.mxu1 }
 0x616   : > { %v711_v49 = vpop.f32.mrf.mxu0 }
 0x617   : > { %v715_v50 = vadd.f32 %v711_v49, %v640_v48 }
 0x618   : > { %v895_v51 = vpop.f32.mrf.mxu0 }
 0x619   : > { %716 = vst.msk [vmem:[%s1213_s20] sm:$0xff] %vm395_vm2, %v715_v50 }
 0x61a   : > { %990 = shalt.err (!%p987_p8)
}
 0x61b   : > { %s991_s20 = scalar_lea.hbm %s1257_s9, 128  ;;  %s995_s30 = scalar_lea.hbm %s1314_s7, 256 }
 0x61c   : > { %p992_p10 = scmp.ne.s32.totalorder %s1257_s9, %s991_s20  ;;  %p996_p13 = scmp.lt.s32.totalorder %s1257_s9, %s1314_s7 }
 0x61d   : > { %p997_p0 = scmp.lt.s32.totalorder %s995_s30, %s991_s20 }
 0x61e   : > { %p993_p11 = pnand %p992_p10, %p1165_p3 }
 0x61f   : > { %p998_p1 = por %p997_p0, %p996_p13 }
 0x620   : > { %p994_p12 = pneg %p993_p11 }
 0x622   : > { %p999_p2 = pnand %p998_p1, %p994_p12 }
 0x624   : > { %1002 = shalt.err (!%p999_p2)
}
 0x625   : > { %896 = dma.vmem_to_hbm [thread:$0]  (%p1165_p3), %s732_s21, 128, %s1257_s9, %s718_s15  }
 0x626 PF: > { %s1333_s18 = sld [smem:[#allocation6_spill]]  ;;  %p902_p4 = scmp.ge.s32.totalorder %s1069_s8, 2 }
 0x628   : > { %p899_p5 = pnand %p902_p4, %p1175_p9 }
 0x62a   : > { %p900_p6 = pneg %p899_p5 }
 0x62c   : > { %s743_s29 = sand.u32 1, %s1333_s18  }
 0x62d   : > { %s744_s11 = scalar_lea.sflag [#allocation4], %s743_s29 }
 0x62e   : > { %1036 = dma.done.wait (%p900_p6), %s744_s11, 128  }
 0x62f   : > { %1038 = vsyncadd (%p900_p6), %s744_s11, 4294967168  ;;  %s20_s8 = sadd.s32 1, %s1069_s8   ;;  %s1335_s23 = sld [smem:[#allocation7_spill]] }
 0x630   : > { %p17_p7 = scmp.ge.s32.totalorder %s20_s8, 10   ;;  %s1336_s26 = sld [smem:[#allocation13_spill]] }
 0x631   : > { %s1337_s27 = sld [smem:[#allocation8_spill]]  ;;  %s1341_s24 = smov %s1045_s25 }
 0x632   : > { %s1338_s28 = sld [smem:[#allocation9_spill]]  ;;  %19 = sbr.rel (!%p17_p7) target bundleno = 5 (0x5), region = 96 }
 0x633   : > { %s1339_s29 = sld [smem:[#allocation10_spill]] }
 0x634   : > { %s1340_s30 = sld [smem:[#allocation11_spill]] }
 0x635   : > { %s1342_s25 = smov %s1335_s23 }
 0x637   :  { %749 = vsyncpa [#allocation4], 1 }
 0x638   :  { %751 = vsyncpa [#allocation4 + $0x1], 1 }

</bundles_post_ra>
